<compile_context>
chip_gen: v7x
topology: tpu7x:2x2x1
jax: 0.10.0
libtpu: 0.0.40
codegen_flags: <defaults>
</compile_context>

<pallas_src>
import functools

import numpy as np

import jax
import jax.numpy as jnp
from jax import lax
from jax.experimental import pallas as pl
from jax.experimental.pallas import tpu as pltpu


def _detection_kernel(x_ref, o_ref, *, num_anchors, num_attrs, grid_size, hw,
                      stride, anchors_over_stride):
    _, ch, ct = x_ref.shape
    f32 = jnp.float32
    out_dt = o_ref.dtype

    # Absolute spatial (flat h*W+w) index of each column in this tile: (1, ct).
    col = (lax.broadcasted_iota(jnp.int32, (1, ct), 1)
           + ct * pl.program_id(1)).astype(f32)
    # Selects row 0 vs row 1 when broadcasting per-column rows to the 2 xy/wh rows.
    row_is0 = lax.broadcasted_iota(jnp.int32, (2, ct), 0) == 0

    inv_na = 1.0 / float(num_anchors)
    inv_gs = 1.0 / float(grid_size)

    def divmod_exact(num, den, inv_den):
        # Exact integer floor-div / mod for small non-negative f32 integers.
        # One correction step makes it robust even if `* inv_den` is lowered
        # to an approximate reciprocal.
        den_f = float(den)
        q = jnp.floor(num * inv_den)
        r = num - q * den_f
        hi = r >= den_f
        q = jnp.where(hi, q + 1.0, q)
        r = jnp.where(hi, r - den_f, r)
        lo = r < 0.0
        q = jnp.where(lo, q - 1.0, q)
        r = jnp.where(lo, r + den_f, r)
        return q, r

    for a in range(num_anchors):                    # static, tiny (na <= 9)
        base = a * num_attrs

        # Flat row index n = a*hw + col of the module's (N, A) view, per column.
        n_idx = col + float(a * hw)                                 # (1, ct)
        # Quirky positional pairing from the PyTorch module: tables are
        # cell-major with anchor fastest, applied to anchor-major rows.
        cellp, anc_i = divmod_exact(n_idx, num_anchors, inv_na)     # n//na, n%na
        off0, off1 = divmod_exact(cellp, grid_size, inv_gs)         # cell offsets

        # Anchor (w, h) / stride selected per column from trace-time constants.
        aw = jnp.full_like(col, anchors_over_stride[0][0])
        ah = jnp.full_like(col, anchors_over_stride[0][1])
        for k in range(1, num_anchors):
            sel = anc_i == float(k)
            aw = jnp.where(sel, anchors_over_stride[k][0], aw)
            ah = jnp.where(sel, anchors_over_stride[k][1], ah)

        # attrs 0:2 -> (sigmoid(x) + cell_offset) * stride
        xy = x_ref[0, base:base + 2, :].astype(f32)                 # (2, ct)
        off = jnp.where(row_is0, off0, off1)                        # (2, ct)
        sig_xy = pl.reciprocal(1.0 + jnp.exp(-xy))
        o_ref[0, base:base + 2, :] = ((sig_xy + off) * stride).astype(out_dt)

        # attrs 2:4 -> exp(x) * (anchor/stride) * stride   (exp directly; no recip)
        wh = x_ref[0, base + 2:base + 4, :].astype(f32)             # (2, ct)
        anc = jnp.where(row_is0, aw, ah)                            # (2, ct)
        o_ref[0, base + 2:base + 4, :] = (jnp.exp(wh) * anc * stride).astype(out_dt)

        # attrs 4: -> sigmoid(x)
        rest = x_ref[0, base + 4:base + num_attrs, :].astype(f32)
        o_ref[0, base + 4:base + num_attrs, :] = (
            pl.reciprocal(1.0 + jnp.exp(-rest))).astype(out_dt)


def _choose_col_tile(ch, hw, itemsize, target_block_bytes=2 << 20, min_col_blocks=2):
    """Lane tile: multiple of 128 (ragged last block is fine), sized so that
    (a) the block stays under ~target_block_bytes (v5e scoped-VMEM safe) and
    (b) there are >= min_col_blocks column steps per batch for pipelining /
    v7x's two TensorCores whenever hw allows it."""
    if hw <= 128:
        return hw                                   # full dim; nothing to split
    n_units = -(-hw // 128)                         # ceil(hw / 128)
    bytes_per_unit = ch * 128 * itemsize
    max_units_vmem = max(1, target_block_bytes // bytes_per_unit)
    max_units_steps = max(1, -(-n_units // min_col_blocks))
    units = max(1, min(n_units, max_units_vmem, max_units_steps))
    return units * 128


def detection_layer_forward(x, image_size, anchors, classes, training=False,
                            target_block_bytes=2 << 20):
    # Anchors / stride are static module config -> trace-time constants.
    anchors_np = np.asarray(anchors, dtype=np.float64)
    num_anchors = int(anchors_np.shape[0])
    num_attrs = int(classes) + 5
    bs, ch, fm_h, fm_w = x.shape
    assert ch == num_anchors * num_attrs
    stride = int(image_size) // int(fm_w)
    hw = fm_h * fm_w

    if training:
        # Training mode is a pure reshape/permute passthrough (no decode math).
        xr = x.reshape(bs, num_anchors, num_attrs, fm_h, fm_w)
        return jnp.transpose(xr, (0, 1, 3, 4, 2))

    assert fm_h == fm_w, "DetectionLayer.make_grid assumes a square feature map"

    # Free reshape (no data movement): NCHW -> (bs, C, H*W); H*W is the lane axis.
    xf = x.reshape(bs, ch, hw)
    itemsize = jnp.dtype(x.dtype).itemsize

    col_tile = _choose_col_tile(ch, hw, itemsize, target_block_bytes)
    n_col = pl.cdiv(hw, col_tile)

    anc_ws = tuple((float(w) / stride, float(h) / stride) for w, h in anchors_np)

    kernel = functools.partial(
        _detection_kernel, num_anchors=num_anchors, num_attrs=num_attrs,
        grid_size=int(fm_h), hw=hw, stride=float(stride),
        anchors_over_stride=anc_ws)

    cost = pl.CostEstimate(
        flops=int(10 * bs * ch * hw),
        transcendentals=int(bs * ch * hw),
        bytes_accessed=int(2 * bs * ch * hw * itemsize))

    out = pl.pallas_call(
        kernel,
        out_shape=jax.ShapeDtypeStruct((bs, ch, hw), x.dtype),
        grid_spec=pltpu.PrefetchScalarGridSpec(
            num_scalar_prefetch=0,
            grid=(bs, n_col),
            in_specs=[pl.BlockSpec((1, ch, col_tile), lambda b, c: (b, 0, c))],
            out_specs=pl.BlockSpec((1, ch, col_tile), lambda b, c: (b, 0, c)),
        ),
        compiler_params=pltpu.CompilerParams(
            dimension_semantics=("parallel", "parallel"),
            vmem_limit_bytes=48 * 1024 * 1024),
        cost_estimate=cost,
    )(xf)

    # TODO(synk): the module's attrs-last layout needs one XLA transpose; consumers
    # that immediately flatten to (bs, N, A) for cross-scale concat/NMS should use
    # the lane-dense (bs, ch, hw) kernel output and transpose once after concat.
    out = out.reshape(bs, num_anchors, num_attrs, fm_h, fm_w)
    return jnp.transpose(out, (0, 1, 3, 4, 2))


def _reference_forward(x, image_size, anchors, classes):
    """Pure-JAX mirror of the PyTorch eval forward (for correctness check)."""
    bs, ch, fm_h, fm_w = x.shape
    num_anchors = anchors.shape[0]
    num_attrs = classes + 5
    stride = image_size // fm_w
    xr = x.reshape(bs, num_anchors, num_attrs, fm_h, fm_w)
    xr = jnp.transpose(xr, (0, 1, 3, 4, 2)).reshape(bs, -1, num_attrs)

    g = jnp.arange(fm_h)
    gx, gy = jnp.meshgrid(g, g, indexing="ij")
    offs = jnp.concatenate([gx.reshape(-1, 1), gy.reshape(-1, 1)], axis=1)
    offs = jnp.tile(offs, (1, num_anchors)).reshape(-1, 2)[None].astype(x.dtype)
    anc = (anchors.astype(x.dtype) / float(stride))
    anc = jnp.tile(anc, (fm_h * fm_w, 1))[None]

    xy = (jax.nn.sigmoid(xr[..., 0:2]) + offs) * stride
    wh = (jnp.exp(xr[..., 2:4]) * anc) * stride
    rest = jax.nn.sigmoid(xr[..., 4:])
    out = jnp.concatenate([xy, wh, rest], axis=-1)
    return out.reshape(bs, num_anchors, fm_h, fm_w, num_attrs)


if __name__ == "__main__":
    key = jax.random.PRNGKey(0)
    k1, k2 = jax.random.split(key)

    # deterministic "parameters": YOLO-style anchors for 3 anchors, 3 classes
    anchors = [[10.0, 13.0], [16.0, 30.0], [33.0, 23.0]]
    classes = 3
    na = len(anchors)
    num_attrs = classes + 5                       # 8

    # Case 1: 16x16 feature map (hw = 256, even 128-lane tiles), bs = 2
    bs, fm, image_size = 2, 16, 128               # -> stride 8
    x1 = jax.random.normal(k1, (bs, na * num_attrs, fm, fm), jnp.float32)
    out1 = jax.block_until_ready(
        detection_layer_forward(x1, image_size, anchors, classes, training=False))
    ref1 = _reference_forward(x1, image_size, jnp.asarray(anchors, jnp.float32), classes)
    assert out1.shape == (bs, na, fm, fm, num_attrs)
    assert jnp.allclose(out1, ref1, atol=1e-5, rtol=1e-5), "mismatch vs reference (16x16)"

    # Case 2: 13x13 feature map (hw = 169, ragged last 128-lane block), bs = 1
    fm2, image2 = 13, 416                          # -> stride 32
    x2 = jax.random.normal(k2, (1, na * num_attrs, fm2, fm2), jnp.float32)
    out2 = jax.block_until_ready(
        detection_layer_forward(x2, image2, anchors, classes, training=False))
    ref2 = _reference_forward(x2, image2, jnp.asarray(anchors, jnp.float32), classes)
    assert out2.shape == (1, na, fm2, fm2, num_attrs)
    assert jnp.allclose(out2, ref2, atol=1e-5, rtol=1e-5), "mismatch vs reference (13x13)"

    print("KERNEL_OK")
</pallas_src>

<mosaic_0001>
module attributes {stable_mosaic.version = 11 : i64} {
  func.func @_detection_kernel(%arg0: i32, %arg1: i32, %arg2: memref<1x24x128xf32, #tpu.memory_space<vmem>>, %arg3: memref<1x24x128xf32, #tpu.memory_space<vmem>>) attributes {dimension_semantics = [#tpu.dimension_semantics<parallel>, #tpu.dimension_semantics<parallel>], iteration_bounds = array<i64: 2, 2>, scalar_prefetch = 0 : i64, scratch_operands = 0 : i64, tpu.core_type = #tpu.core_type<tc>, window_params = [{transform_indices = @transform_0, window_bounds = array<i64: 1, 24, 128>}, {transform_indices = @transform_1, window_bounds = array<i64: 1, 24, 128>}]} {
    %0 = tpu.iota {dimensions = array<i32: 1>} : vector<1x128xi32>
    %c128_i32 = arith.constant 128 : i32
    %1 = arith.muli %c128_i32, %arg1 : i32
    %2 = vector.broadcast %1 : i32 to vector<1x128xi32>
    %3 = arith.addi %0, %2 : vector<1x128xi32>
    %4 = arith.sitofp %3 : vector<1x128xi32> to vector<1x128xf32>
    %5 = tpu.iota {dimensions = array<i32: 0>} : vector<2x128xi32>
    %c0_i32 = arith.constant 0 : i32
    %6 = vector.broadcast %c0_i32 : i32 to vector<2x128xi32>
    %7 = arith.cmpi eq, %5, %6 : vector<2x128xi32>
    %cst = arith.constant 0.000000e+00 : f32
    %8 = vector.broadcast %cst : f32 to vector<1x128xf32>
    %9 = arith.addf %4, %8 : vector<1x128xf32>
    %cst_0 = arith.constant 0.333333343 : f32
    %10 = vector.broadcast %cst_0 : f32 to vector<1x128xf32>
    %11 = arith.mulf %9, %10 : vector<1x128xf32>
    %12 = math.floor %11 : vector<1x128xf32>
    %cst_1 = arith.constant 3.000000e+00 : f32
    %13 = vector.broadcast %cst_1 : f32 to vector<1x128xf32>
    %14 = arith.mulf %12, %13 : vector<1x128xf32>
    %15 = arith.subf %9, %14 : vector<1x128xf32>
    %cst_2 = arith.constant 3.000000e+00 : f32
    %16 = vector.broadcast %cst_2 : f32 to vector<1x128xf32>
    %17 = arith.cmpf oge, %15, %16 : vector<1x128xf32>
    %cst_3 = arith.constant 1.000000e+00 : f32
    %18 = vector.broadcast %cst_3 : f32 to vector<1x128xf32>
    %19 = arith.addf %12, %18 : vector<1x128xf32>
    %20 = arith.select %17, %19, %12 : vector<1x128xi1>, vector<1x128xf32>
    %cst_4 = arith.constant 3.000000e+00 : f32
    %21 = vector.broadcast %cst_4 : f32 to vector<1x128xf32>
    %22 = arith.subf %15, %21 : vector<1x128xf32>
    %23 = arith.select %17, %22, %15 : vector<1x128xi1>, vector<1x128xf32>
    %cst_5 = arith.constant 0.000000e+00 : f32
    %24 = vector.broadcast %cst_5 : f32 to vector<1x128xf32>
    %25 = arith.cmpf olt, %23, %24 : vector<1x128xf32>
    %cst_6 = arith.constant 1.000000e+00 : f32
    %26 = vector.broadcast %cst_6 : f32 to vector<1x128xf32>
    %27 = arith.subf %20, %26 : vector<1x128xf32>
    %28 = arith.select %25, %27, %20 : vector<1x128xi1>, vector<1x128xf32>
    %cst_7 = arith.constant 3.000000e+00 : f32
    %29 = vector.broadcast %cst_7 : f32 to vector<1x128xf32>
    %30 = arith.addf %23, %29 : vector<1x128xf32>
    %31 = arith.select %25, %30, %23 : vector<1x128xi1>, vector<1x128xf32>
    %cst_8 = arith.constant 6.250000e-02 : f32
    %32 = vector.broadcast %cst_8 : f32 to vector<1x128xf32>
    %33 = arith.mulf %28, %32 : vector<1x128xf32>
    %34 = math.floor %33 : vector<1x128xf32>
    %cst_9 = arith.constant 1.600000e+01 : f32
    %35 = vector.broadcast %cst_9 : f32 to vector<1x128xf32>
    %36 = arith.mulf %34, %35 : vector<1x128xf32>
    %37 = arith.subf %28, %36 : vector<1x128xf32>
    %cst_10 = arith.constant 1.600000e+01 : f32
    %38 = vector.broadcast %cst_10 : f32 to vector<1x128xf32>
    %39 = arith.cmpf oge, %37, %38 : vector<1x128xf32>
    %cst_11 = arith.constant 1.000000e+00 : f32
    %40 = vector.broadcast %cst_11 : f32 to vector<1x128xf32>
    %41 = arith.addf %34, %40 : vector<1x128xf32>
    %42 = arith.select %39, %41, %34 : vector<1x128xi1>, vector<1x128xf32>
    %cst_12 = arith.constant 1.600000e+01 : f32
    %43 = vector.broadcast %cst_12 : f32 to vector<1x128xf32>
    %44 = arith.subf %37, %43 : vector<1x128xf32>
    %45 = arith.select %39, %44, %37 : vector<1x128xi1>, vector<1x128xf32>
    %cst_13 = arith.constant 0.000000e+00 : f32
    %46 = vector.broadcast %cst_13 : f32 to vector<1x128xf32>
    %47 = arith.cmpf olt, %45, %46 : vector<1x128xf32>
    %cst_14 = arith.constant 1.000000e+00 : f32
    %48 = vector.broadcast %cst_14 : f32 to vector<1x128xf32>
    %49 = arith.subf %42, %48 : vector<1x128xf32>
    %50 = arith.select %47, %49, %42 : vector<1x128xi1>, vector<1x128xf32>
    %cst_15 = arith.constant 1.600000e+01 : f32
    %51 = vector.broadcast %cst_15 : f32 to vector<1x128xf32>
    %52 = arith.addf %45, %51 : vector<1x128xf32>
    %53 = arith.select %47, %52, %45 : vector<1x128xi1>, vector<1x128xf32>
    %cst_16 = arith.constant 1.250000e+00 : f32
    %54 = vector.broadcast %cst_16 : f32 to vector<1x128xf32>
    %cst_17 = arith.constant 1.625000e+00 : f32
    %55 = vector.broadcast %cst_17 : f32 to vector<1x128xf32>
    %cst_18 = arith.constant 1.000000e+00 : f32
    %56 = vector.broadcast %cst_18 : f32 to vector<1x128xf32>
    %57 = arith.cmpf oeq, %31, %56 : vector<1x128xf32>
    %cst_19 = arith.constant 2.000000e+00 : f32
    %58 = vector.broadcast %cst_19 : f32 to vector<1x128xf32>
    %59 = arith.select %57, %58, %54 : vector<1x128xi1>, vector<1x128xf32>
    %cst_20 = arith.constant 3.750000e+00 : f32
    %60 = vector.broadcast %cst_20 : f32 to vector<1x128xf32>
    %61 = arith.select %57, %60, %55 : vector<1x128xi1>, vector<1x128xf32>
    %cst_21 = arith.constant 2.000000e+00 : f32
    %62 = vector.broadcast %cst_21 : f32 to vector<1x128xf32>
    %63 = arith.cmpf oeq, %31, %62 : vector<1x128xf32>
    %cst_22 = arith.constant 4.125000e+00 : f32
    %64 = vector.broadcast %cst_22 : f32 to vector<1x128xf32>
    %65 = arith.select %63, %64, %59 : vector<1x128xi1>, vector<1x128xf32>
    %cst_23 = arith.constant 2.875000e+00 : f32
    %66 = vector.broadcast %cst_23 : f32 to vector<1x128xf32>
    %67 = arith.select %63, %66, %61 : vector<1x128xi1>, vector<1x128xf32>
    %c0 = arith.constant 0 : index
    %c0_24 = arith.constant 0 : index
    %c0_25 = arith.constant 0 : index
    %68 = vector.load %arg2[%c0, %c0_24, %c0_25] : memref<1x24x128xf32, #tpu.memory_space<vmem>>, vector<1x2x128xf32>
    %69 = vector.shape_cast %68 : vector<1x2x128xf32> to vector<2x128xf32>
    %70 = vector.shape_cast %50 : vector<1x128xf32> to vector<1x128xf32>
    %71 = vector.broadcast %70 : vector<1x128xf32> to vector<2x128xf32>
    %72 = vector.shape_cast %53 : vector<1x128xf32> to vector<1x128xf32>
    %73 = vector.broadcast %72 : vector<1x128xf32> to vector<2x128xf32>
    %74 = arith.select %7, %71, %73 : vector<2x128xi1>, vector<2x128xf32>
    %cst_26 = arith.constant 0.000000e+00 : f32
    %75 = vector.broadcast %cst_26 : f32 to vector<2x128xf32>
    %76 = arith.subf %75, %69 : vector<2x128xf32>
    %77 = math.exp %76 : vector<2x128xf32>
    %cst_27 = arith.constant 1.000000e+00 : f32
    %78 = vector.broadcast %cst_27 : f32 to vector<2x128xf32>
    %79 = arith.addf %78, %77 : vector<2x128xf32>
    %80 = tpu.reciprocal %79 : vector<2x128xf32> -> vector<2x128xf32>
    %81 = arith.addf %80, %74 : vector<2x128xf32>
    %cst_28 = arith.constant 8.000000e+00 : f32
    %82 = vector.broadcast %cst_28 : f32 to vector<2x128xf32>
    %83 = arith.mulf %81, %82 : vector<2x128xf32>
    %c0_29 = arith.constant 0 : index
    %c0_30 = arith.constant 0 : index
    %c0_31 = arith.constant 0 : index
    %84 = vector.load %arg3[%c0_29, %c0_30, %c0_31] : memref<1x24x128xf32, #tpu.memory_space<vmem>>, vector<1x2x128xf32>
    %85 = vector.shape_cast %84 : vector<1x2x128xf32> to vector<2x128xf32>
    %86 = vector.shape_cast %83 : vector<2x128xf32> to vector<1x2x128xf32>
    tpu.vector_store %arg3[%c0_29, %c0_30, %c0_31], %86 {strides = array<i32>} : memref<1x24x128xf32, #tpu.memory_space<vmem>>, vector<1x2x128xf32>,
    %c0_32 = arith.constant 0 : index
    %c2 = arith.constant 2 : index
    %c0_33 = arith.constant 0 : index
    %87 = vector.load %arg2[%c0_32, %c2, %c0_33] : memref<1x24x128xf32, #tpu.memory_space<vmem>>, vector<1x2x128xf32>
    %88 = vector.shape_cast %87 : vector<1x2x128xf32> to vector<2x128xf32>
    %89 = vector.shape_cast %65 : vector<1x128xf32> to vector<1x128xf32>
    %90 = vector.broadcast %89 : vector<1x128xf32> to vector<2x128xf32>
    %91 = vector.shape_cast %67 : vector<1x128xf32> to vector<1x128xf32>
    %92 = vector.broadcast %91 : vector<1x128xf32> to vector<2x128xf32>
    %93 = arith.select %7, %90, %92 : vector<2x128xi1>, vector<2x128xf32>
    %94 = math.exp %88 : vector<2x128xf32>
    %95 = arith.mulf %94, %93 : vector<2x128xf32>
    %cst_34 = arith.constant 8.000000e+00 : f32
    %96 = vector.broadcast %cst_34 : f32 to vector<2x128xf32>
    %97 = arith.mulf %95, %96 : vector<2x128xf32>
    %c0_35 = arith.constant 0 : index
    %c2_36 = arith.constant 2 : index
    %c0_37 = arith.constant 0 : index
    %98 = vector.load %arg3[%c0_35, %c2_36, %c0_37] : memref<1x24x128xf32, #tpu.memory_space<vmem>>, vector<1x2x128xf32>
    %99 = vector.shape_cast %98 : vector<1x2x128xf32> to vector<2x128xf32>
    %100 = vector.shape_cast %97 : vector<2x128xf32> to vector<1x2x128xf32>
    tpu.vector_store %arg3[%c0_35, %c2_36, %c0_37], %100 {strides = array<i32>} : memref<1x24x128xf32, #tpu.memory_space<vmem>>, vector<1x2x128xf32>,
    %c0_38 = arith.constant 0 : index
    %c4 = arith.constant 4 : index
    %c0_39 = arith.constant 0 : index
    %101 = vector.load %arg2[%c0_38, %c4, %c0_39] : memref<1x24x128xf32, #tpu.memory_space<vmem>>, vector<1x4x128xf32>
    %102 = vector.shape_cast %101 : vector<1x4x128xf32> to vector<4x128xf32>
    %cst_40 = arith.constant 0.000000e+00 : f32
    %103 = vector.broadcast %cst_40 : f32 to vector<4x128xf32>
    %104 = arith.subf %103, %102 : vector<4x128xf32>
    %105 = math.exp %104 : vector<4x128xf32>
    %cst_41 = arith.constant 1.000000e+00 : f32
    %106 = vector.broadcast %cst_41 : f32 to vector<4x128xf32>
    %107 = arith.addf %106, %105 : vector<4x128xf32>
    %108 = tpu.reciprocal %107 : vector<4x128xf32> -> vector<4x128xf32>
    %c0_42 = arith.constant 0 : index
    %c4_43 = arith.constant 4 : index
    %c0_44 = arith.constant 0 : index
    %109 = vector.load %arg3[%c0_42, %c4_43, %c0_44] : memref<1x24x128xf32, #tpu.memory_space<vmem>>, vector<1x4x128xf32>
    %110 = vector.shape_cast %109 : vector<1x4x128xf32> to vector<4x128xf32>
    %111 = vector.shape_cast %108 : vector<4x128xf32> to vector<1x4x128xf32>
    tpu.vector_store %arg3[%c0_42, %c4_43, %c0_44], %111 {strides = array<i32>} : memref<1x24x128xf32, #tpu.memory_space<vmem>>, vector<1x4x128xf32>,
    %cst_45 = arith.constant 2.560000e+02 : f32
    %112 = vector.broadcast %cst_45 : f32 to vector<1x128xf32>
    %113 = arith.addf %4, %112 : vector<1x128xf32>
    %cst_46 = arith.constant 0.333333343 : f32
    %114 = vector.broadcast %cst_46 : f32 to vector<1x128xf32>
    %115 = arith.mulf %113, %114 : vector<1x128xf32>
    %116 = math.floor %115 : vector<1x128xf32>
    %cst_47 = arith.constant 3.000000e+00 : f32
    %117 = vector.broadcast %cst_47 : f32 to vector<1x128xf32>
    %118 = arith.mulf %116, %117 : vector<1x128xf32>
    %119 = arith.subf %113, %118 : vector<1x128xf32>
    %cst_48 = arith.constant 3.000000e+00 : f32
    %120 = vector.broadcast %cst_48 : f32 to vector<1x128xf32>
    %121 = arith.cmpf oge, %119, %120 : vector<1x128xf32>
    %cst_49 = arith.constant 1.000000e+00 : f32
    %122 = vector.broadcast %cst_49 : f32 to vector<1x128xf32>
    %123 = arith.addf %116, %122 : vector<1x128xf32>
    %124 = arith.select %121, %123, %116 : vector<1x128xi1>, vector<1x128xf32>
    %cst_50 = arith.constant 3.000000e+00 : f32
    %125 = vector.broadcast %cst_50 : f32 to vector<1x128xf32>
    %126 = arith.subf %119, %125 : vector<1x128xf32>
    %127 = arith.select %121, %126, %119 : vector<1x128xi1>, vector<1x128xf32>
    %cst_51 = arith.constant 0.000000e+00 : f32
    %128 = vector.broadcast %cst_51 : f32 to vector<1x128xf32>
    %129 = arith.cmpf olt, %127, %128 : vector<1x128xf32>
    %cst_52 = arith.constant 1.000000e+00 : f32
    %130 = vector.broadcast %cst_52 : f32 to vector<1x128xf32>
    %131 = arith.subf %124, %130 : vector<1x128xf32>
    %132 = arith.select %129, %131, %124 : vector<1x128xi1>, vector<1x128xf32>
    %cst_53 = arith.constant 3.000000e+00 : f32
    %133 = vector.broadcast %cst_53 : f32 to vector<1x128xf32>
    %134 = arith.addf %127, %133 : vector<1x128xf32>
    %135 = arith.select %129, %134, %127 : vector<1x128xi1>, vector<1x128xf32>
    %cst_54 = arith.constant 6.250000e-02 : f32
    %136 = vector.broadcast %cst_54 : f32 to vector<1x128xf32>
    %137 = arith.mulf %132, %136 : vector<1x128xf32>
    %138 = math.floor %137 : vector<1x128xf32>
    %cst_55 = arith.constant 1.600000e+01 : f32
    %139 = vector.broadcast %cst_55 : f32 to vector<1x128xf32>
    %140 = arith.mulf %138, %139 : vector<1x128xf32>
    %141 = arith.subf %132, %140 : vector<1x128xf32>
    %cst_56 = arith.constant 1.600000e+01 : f32
    %142 = vector.broadcast %cst_56 : f32 to vector<1x128xf32>
    %143 = arith.cmpf oge, %141, %142 : vector<1x128xf32>
    %cst_57 = arith.constant 1.000000e+00 : f32
    %144 = vector.broadcast %cst_57 : f32 to vector<1x128xf32>
    %145 = arith.addf %138, %144 : vector<1x128xf32>
    %146 = arith.select %143, %145, %138 : vector<1x128xi1>, vector<1x128xf32>
    %cst_58 = arith.constant 1.600000e+01 : f32
    %147 = vector.broadcast %cst_58 : f32 to vector<1x128xf32>
    %148 = arith.subf %141, %147 : vector<1x128xf32>
    %149 = arith.select %143, %148, %141 : vector<1x128xi1>, vector<1x128xf32>
    %cst_59 = arith.constant 0.000000e+00 : f32
    %150 = vector.broadcast %cst_59 : f32 to vector<1x128xf32>
    %151 = arith.cmpf olt, %149, %150 : vector<1x128xf32>
    %cst_60 = arith.constant 1.000000e+00 : f32
    %152 = vector.broadcast %cst_60 : f32 to vector<1x128xf32>
    %153 = arith.subf %146, %152 : vector<1x128xf32>
    %154 = arith.select %151, %153, %146 : vector<1x128xi1>, vector<1x128xf32>
    %cst_61 = arith.constant 1.600000e+01 : f32
    %155 = vector.broadcast %cst_61 : f32 to vector<1x128xf32>
    %156 = arith.addf %149, %155 : vector<1x128xf32>
    %157 = arith.select %151, %156, %149 : vector<1x128xi1>, vector<1x128xf32>
    %cst_62 = arith.constant 1.250000e+00 : f32
    %158 = vector.broadcast %cst_62 : f32 to vector<1x128xf32>
    %cst_63 = arith.constant 1.625000e+00 : f32
    %159 = vector.broadcast %cst_63 : f32 to vector<1x128xf32>
    %cst_64 = arith.constant 1.000000e+00 : f32
    %160 = vector.broadcast %cst_64 : f32 to vector<1x128xf32>
    %161 = arith.cmpf oeq, %135, %160 : vector<1x128xf32>
    %cst_65 = arith.constant 2.000000e+00 : f32
    %162 = vector.broadcast %cst_65 : f32 to vector<1x128xf32>
    %163 = arith.select %161, %162, %158 : vector<1x128xi1>, vector<1x128xf32>
    %cst_66 = arith.constant 3.750000e+00 : f32
    %164 = vector.broadcast %cst_66 : f32 to vector<1x128xf32>
    %165 = arith.select %161, %164, %159 : vector<1x128xi1>, vector<1x128xf32>
    %cst_67 = arith.constant 2.000000e+00 : f32
    %166 = vector.broadcast %cst_67 : f32 to vector<1x128xf32>
    %167 = arith.cmpf oeq, %135, %166 : vector<1x128xf32>
    %cst_68 = arith.constant 4.125000e+00 : f32
    %168 = vector.broadcast %cst_68 : f32 to vector<1x128xf32>
    %169 = arith.select %167, %168, %163 : vector<1x128xi1>, vector<1x128xf32>
    %cst_69 = arith.constant 2.875000e+00 : f32
    %170 = vector.broadcast %cst_69 : f32 to vector<1x128xf32>
    %171 = arith.select %167, %170, %165 : vector<1x128xi1>, vector<1x128xf32>
    %c0_70 = arith.constant 0 : index
    %c8 = arith.constant 8 : index
    %c0_71 = arith.constant 0 : index
    %172 = vector.load %arg2[%c0_70, %c8, %c0_71] : memref<1x24x128xf32, #tpu.memory_space<vmem>>, vector<1x2x128xf32>
    %173 = vector.shape_cast %172 : vector<1x2x128xf32> to vector<2x128xf32>
    %174 = vector.shape_cast %154 : vector<1x128xf32> to vector<1x128xf32>
    %175 = vector.broadcast %174 : vector<1x128xf32> to vector<2x128xf32>
    %176 = vector.shape_cast %157 : vector<1x128xf32> to vector<1x128xf32>
    %177 = vector.broadcast %176 : vector<1x128xf32> to vector<2x128xf32>
    %178 = arith.select %7, %175, %177 : vector<2x128xi1>, vector<2x128xf32>
    %cst_72 = arith.constant 0.000000e+00 : f32
    %179 = vector.broadcast %cst_72 : f32 to vector<2x128xf32>
    %180 = arith.subf %179, %173 : vector<2x128xf32>
    %181 = math.exp %180 : vector<2x128xf32>
    %cst_73 = arith.constant 1.000000e+00 : f32
    %182 = vector.broadcast %cst_73 : f32 to vector<2x128xf32>
    %183 = arith.addf %182, %181 : vector<2x128xf32>
    %184 = tpu.reciprocal %183 : vector<2x128xf32> -> vector<2x128xf32>
    %185 = arith.addf %184, %178 : vector<2x128xf32>
    %cst_74 = arith.constant 8.000000e+00 : f32
    %186 = vector.broadcast %cst_74 : f32 to vector<2x128xf32>
    %187 = arith.mulf %185, %186 : vector<2x128xf32>
    %c0_75 = arith.constant 0 : index
    %c8_76 = arith.constant 8 : index
    %c0_77 = arith.constant 0 : index
    %188 = vector.load %arg3[%c0_75, %c8_76, %c0_77] : memref<1x24x128xf32, #tpu.memory_space<vmem>>, vector<1x2x128xf32>
    %189 = vector.shape_cast %188 : vector<1x2x128xf32> to vector<2x128xf32>
    %190 = vector.shape_cast %187 : vector<2x128xf32> to vector<1x2x128xf32>
    tpu.vector_store %arg3[%c0_75, %c8_76, %c0_77], %190 {strides = array<i32>} : memref<1x24x128xf32, #tpu.memory_space<vmem>>, vector<1x2x128xf32>,
    %c0_78 = arith.constant 0 : index
    %c10 = arith.constant 10 : index
    %c0_79 = arith.constant 0 : index
    %191 = vector.load %arg2[%c0_78, %c10, %c0_79] : memref<1x24x128xf32, #tpu.memory_space<vmem>>, vector<1x2x128xf32>
    %192 = vector.shape_cast %191 : vector<1x2x128xf32> to vector<2x128xf32>
    %193 = vector.shape_cast %169 : vector<1x128xf32> to vector<1x128xf32>
    %194 = vector.broadcast %193 : vector<1x128xf32> to vector<2x128xf32>
    %195 = vector.shape_cast %171 : vector<1x128xf32> to vector<1x128xf32>
    %196 = vector.broadcast %195 : vector<1x128xf32> to vector<2x128xf32>
    %197 = arith.select %7, %194, %196 : vector<2x128xi1>, vector<2x128xf32>
    %198 = math.exp %192 : vector<2x128xf32>
    %199 = arith.mulf %198, %197 : vector<2x128xf32>
    %cst_80 = arith.constant 8.000000e+00 : f32
    %200 = vector.broadcast %cst_80 : f32 to vector<2x128xf32>
    %201 = arith.mulf %199, %200 : vector<2x128xf32>
    %c0_81 = arith.constant 0 : index
    %c10_82 = arith.constant 10 : index
    %c0_83 = arith.constant 0 : index
    %202 = vector.load %arg3[%c0_81, %c10_82, %c0_83] : memref<1x24x128xf32, #tpu.memory_space<vmem>>, vector<1x2x128xf32>
    %203 = vector.shape_cast %202 : vector<1x2x128xf32> to vector<2x128xf32>
    %204 = vector.shape_cast %201 : vector<2x128xf32> to vector<1x2x128xf32>
    tpu.vector_store %arg3[%c0_81, %c10_82, %c0_83], %204 {strides = array<i32>} : memref<1x24x128xf32, #tpu.memory_space<vmem>>, vector<1x2x128xf32>,
    %c0_84 = arith.constant 0 : index
    %c12 = arith.constant 12 : index
    %c0_85 = arith.constant 0 : index
    %205 = vector.load %arg2[%c0_84, %c12, %c0_85] : memref<1x24x128xf32, #tpu.memory_space<vmem>>, vector<1x4x128xf32>
    %206 = vector.shape_cast %205 : vector<1x4x128xf32> to vector<4x128xf32>
    %cst_86 = arith.constant 0.000000e+00 : f32
    %207 = vector.broadcast %cst_86 : f32 to vector<4x128xf32>
    %208 = arith.subf %207, %206 : vector<4x128xf32>
    %209 = math.exp %208 : vector<4x128xf32>
    %cst_87 = arith.constant 1.000000e+00 : f32
    %210 = vector.broadcast %cst_87 : f32 to vector<4x128xf32>
    %211 = arith.addf %210, %209 : vector<4x128xf32>
    %212 = tpu.reciprocal %211 : vector<4x128xf32> -> vector<4x128xf32>
    %c0_88 = arith.constant 0 : index
    %c12_89 = arith.constant 12 : index
    %c0_90 = arith.constant 0 : index
    %213 = vector.load %arg3[%c0_88, %c12_89, %c0_90] : memref<1x24x128xf32, #tpu.memory_space<vmem>>, vector<1x4x128xf32>
    %214 = vector.shape_cast %213 : vector<1x4x128xf32> to vector<4x128xf32>
    %215 = vector.shape_cast %212 : vector<4x128xf32> to vector<1x4x128xf32>
    tpu.vector_store %arg3[%c0_88, %c12_89, %c0_90], %215 {strides = array<i32>} : memref<1x24x128xf32, #tpu.memory_space<vmem>>, vector<1x4x128xf32>,
    %cst_91 = arith.constant 5.120000e+02 : f32
    %216 = vector.broadcast %cst_91 : f32 to vector<1x128xf32>
    %217 = arith.addf %4, %216 : vector<1x128xf32>
    %cst_92 = arith.constant 0.333333343 : f32
    %218 = vector.broadcast %cst_92 : f32 to vector<1x128xf32>
    %219 = arith.mulf %217, %218 : vector<1x128xf32>
    %220 = math.floor %219 : vector<1x128xf32>
    %cst_93 = arith.constant 3.000000e+00 : f32
    %221 = vector.broadcast %cst_93 : f32 to vector<1x128xf32>
    %222 = arith.mulf %220, %221 : vector<1x128xf32>
    %223 = arith.subf %217, %222 : vector<1x128xf32>
    %cst_94 = arith.constant 3.000000e+00 : f32
    %224 = vector.broadcast %cst_94 : f32 to vector<1x128xf32>
    %225 = arith.cmpf oge, %223, %224 : vector<1x128xf32>
    %cst_95 = arith.constant 1.000000e+00 : f32
    %226 = vector.broadcast %cst_95 : f32 to vector<1x128xf32>
    %227 = arith.addf %220, %226 : vector<1x128xf32>
    %228 = arith.select %225, %227, %220 : vector<1x128xi1>, vector<1x128xf32>
    %cst_96 = arith.constant 3.000000e+00 : f32
    %229 = vector.broadcast %cst_96 : f32 to vector<1x128xf32>
    %230 = arith.subf %223, %229 : vector<1x128xf32>
    %231 = arith.select %225, %230, %223 : vector<1x128xi1>, vector<1x128xf32>
    %cst_97 = arith.constant 0.000000e+00 : f32
    %232 = vector.broadcast %cst_97 : f32 to vector<1x128xf32>
    %233 = arith.cmpf olt, %231, %232 : vector<1x128xf32>
    %cst_98 = arith.constant 1.000000e+00 : f32
    %234 = vector.broadcast %cst_98 : f32 to vector<1x128xf32>
    %235 = arith.subf %228, %234 : vector<1x128xf32>
    %236 = arith.select %233, %235, %228 : vector<1x128xi1>, vector<1x128xf32>
    %cst_99 = arith.constant 3.000000e+00 : f32
    %237 = vector.broadcast %cst_99 : f32 to vector<1x128xf32>
    %238 = arith.addf %231, %237 : vector<1x128xf32>
    %239 = arith.select %233, %238, %231 : vector<1x128xi1>, vector<1x128xf32>
    %cst_100 = arith.constant 6.250000e-02 : f32
    %240 = vector.broadcast %cst_100 : f32 to vector<1x128xf32>
    %241 = arith.mulf %236, %240 : vector<1x128xf32>
    %242 = math.floor %241 : vector<1x128xf32>
    %cst_101 = arith.constant 1.600000e+01 : f32
    %243 = vector.broadcast %cst_101 : f32 to vector<1x128xf32>
    %244 = arith.mulf %242, %243 : vector<1x128xf32>
    %245 = arith.subf %236, %244 : vector<1x128xf32>
    %cst_102 = arith.constant 1.600000e+01 : f32
    %246 = vector.broadcast %cst_102 : f32 to vector<1x128xf32>
    %247 = arith.cmpf oge, %245, %246 : vector<1x128xf32>
    %cst_103 = arith.constant 1.000000e+00 : f32
    %248 = vector.broadcast %cst_103 : f32 to vector<1x128xf32>
    %249 = arith.addf %242, %248 : vector<1x128xf32>
    %250 = arith.select %247, %249, %242 : vector<1x128xi1>, vector<1x128xf32>
    %cst_104 = arith.constant 1.600000e+01 : f32
    %251 = vector.broadcast %cst_104 : f32 to vector<1x128xf32>
    %252 = arith.subf %245, %251 : vector<1x128xf32>
    %253 = arith.select %247, %252, %245 : vector<1x128xi1>, vector<1x128xf32>
    %cst_105 = arith.constant 0.000000e+00 : f32
    %254 = vector.broadcast %cst_105 : f32 to vector<1x128xf32>
    %255 = arith.cmpf olt, %253, %254 : vector<1x128xf32>
    %cst_106 = arith.constant 1.000000e+00 : f32
    %256 = vector.broadcast %cst_106 : f32 to vector<1x128xf32>
    %257 = arith.subf %250, %256 : vector<1x128xf32>
    %258 = arith.select %255, %257, %250 : vector<1x128xi1>, vector<1x128xf32>
    %cst_107 = arith.constant 1.600000e+01 : f32
    %259 = vector.broadcast %cst_107 : f32 to vector<1x128xf32>
    %260 = arith.addf %253, %259 : vector<1x128xf32>
    %261 = arith.select %255, %260, %253 : vector<1x128xi1>, vector<1x128xf32>
    %cst_108 = arith.constant 1.250000e+00 : f32
    %262 = vector.broadcast %cst_108 : f32 to vector<1x128xf32>
    %cst_109 = arith.constant 1.625000e+00 : f32
    %263 = vector.broadcast %cst_109 : f32 to vector<1x128xf32>
    %cst_110 = arith.constant 1.000000e+00 : f32
    %264 = vector.broadcast %cst_110 : f32 to vector<1x128xf32>
    %265 = arith.cmpf oeq, %239, %264 : vector<1x128xf32>
    %cst_111 = arith.constant 2.000000e+00 : f32
    %266 = vector.broadcast %cst_111 : f32 to vector<1x128xf32>
    %267 = arith.select %265, %266, %262 : vector<1x128xi1>, vector<1x128xf32>
    %cst_112 = arith.constant 3.750000e+00 : f32
    %268 = vector.broadcast %cst_112 : f32 to vector<1x128xf32>
    %269 = arith.select %265, %268, %263 : vector<1x128xi1>, vector<1x128xf32>
    %cst_113 = arith.constant 2.000000e+00 : f32
    %270 = vector.broadcast %cst_113 : f32 to vector<1x128xf32>
    %271 = arith.cmpf oeq, %239, %270 : vector<1x128xf32>
    %cst_114 = arith.constant 4.125000e+00 : f32
    %272 = vector.broadcast %cst_114 : f32 to vector<1x128xf32>
    %273 = arith.select %271, %272, %267 : vector<1x128xi1>, vector<1x128xf32>
    %cst_115 = arith.constant 2.875000e+00 : f32
    %274 = vector.broadcast %cst_115 : f32 to vector<1x128xf32>
    %275 = arith.select %271, %274, %269 : vector<1x128xi1>, vector<1x128xf32>
    %c0_116 = arith.constant 0 : index
    %c16 = arith.constant 16 : index
    %c0_117 = arith.constant 0 : index
    %276 = vector.load %arg2[%c0_116, %c16, %c0_117] : memref<1x24x128xf32, #tpu.memory_space<vmem>>, vector<1x2x128xf32>
    %277 = vector.shape_cast %276 : vector<1x2x128xf32> to vector<2x128xf32>
    %278 = vector.shape_cast %258 : vector<1x128xf32> to vector<1x128xf32>
    %279 = vector.broadcast %278 : vector<1x128xf32> to vector<2x128xf32>
    %280 = vector.shape_cast %261 : vector<1x128xf32> to vector<1x128xf32>
    %281 = vector.broadcast %280 : vector<1x128xf32> to vector<2x128xf32>
    %282 = arith.select %7, %279, %281 : vector<2x128xi1>, vector<2x128xf32>
    %cst_118 = arith.constant 0.000000e+00 : f32
    %283 = vector.broadcast %cst_118 : f32 to vector<2x128xf32>
    %284 = arith.subf %283, %277 : vector<2x128xf32>
    %285 = math.exp %284 : vector<2x128xf32>
    %cst_119 = arith.constant 1.000000e+00 : f32
    %286 = vector.broadcast %cst_119 : f32 to vector<2x128xf32>
    %287 = arith.addf %286, %285 : vector<2x128xf32>
    %288 = tpu.reciprocal %287 : vector<2x128xf32> -> vector<2x128xf32>
    %289 = arith.addf %288, %282 : vector<2x128xf32>
    %cst_120 = arith.constant 8.000000e+00 : f32
    %290 = vector.broadcast %cst_120 : f32 to vector<2x128xf32>
    %291 = arith.mulf %289, %290 : vector<2x128xf32>
    %c0_121 = arith.constant 0 : index
    %c16_122 = arith.constant 16 : index
    %c0_123 = arith.constant 0 : index
    %292 = vector.load %arg3[%c0_121, %c16_122, %c0_123] : memref<1x24x128xf32, #tpu.memory_space<vmem>>, vector<1x2x128xf32>
    %293 = vector.shape_cast %292 : vector<1x2x128xf32> to vector<2x128xf32>
    %294 = vector.shape_cast %291 : vector<2x128xf32> to vector<1x2x128xf32>
    tpu.vector_store %arg3[%c0_121, %c16_122, %c0_123], %294 {strides = array<i32>} : memref<1x24x128xf32, #tpu.memory_space<vmem>>, vector<1x2x128xf32>,
    %c0_124 = arith.constant 0 : index
    %c18 = arith.constant 18 : index
    %c0_125 = arith.constant 0 : index
    %295 = vector.load %arg2[%c0_124, %c18, %c0_125] : memref<1x24x128xf32, #tpu.memory_space<vmem>>, vector<1x2x128xf32>
    %296 = vector.shape_cast %295 : vector<1x2x128xf32> to vector<2x128xf32>
    %297 = vector.shape_cast %273 : vector<1x128xf32> to vector<1x128xf32>
    %298 = vector.broadcast %297 : vector<1x128xf32> to vector<2x128xf32>
    %299 = vector.shape_cast %275 : vector<1x128xf32> to vector<1x128xf32>
    %300 = vector.broadcast %299 : vector<1x128xf32> to vector<2x128xf32>
    %301 = arith.select %7, %298, %300 : vector<2x128xi1>, vector<2x128xf32>
    %302 = math.exp %296 : vector<2x128xf32>
    %303 = arith.mulf %302, %301 : vector<2x128xf32>
    %cst_126 = arith.constant 8.000000e+00 : f32
    %304 = vector.broadcast %cst_126 : f32 to vector<2x128xf32>
    %305 = arith.mulf %303, %304 : vector<2x128xf32>
    %c0_127 = arith.constant 0 : index
    %c18_128 = arith.constant 18 : index
    %c0_129 = arith.constant 0 : index
    %306 = vector.load %arg3[%c0_127, %c18_128, %c0_129] : memref<1x24x128xf32, #tpu.memory_space<vmem>>, vector<1x2x128xf32>
    %307 = vector.shape_cast %306 : vector<1x2x128xf32> to vector<2x128xf32>
    %308 = vector.shape_cast %305 : vector<2x128xf32> to vector<1x2x128xf32>
    tpu.vector_store %arg3[%c0_127, %c18_128, %c0_129], %308 {strides = array<i32>} : memref<1x24x128xf32, #tpu.memory_space<vmem>>, vector<1x2x128xf32>,
    %c0_130 = arith.constant 0 : index
    %c20 = arith.constant 20 : index
    %c0_131 = arith.constant 0 : index
    %309 = vector.load %arg2[%c0_130, %c20, %c0_131] : memref<1x24x128xf32, #tpu.memory_space<vmem>>, vector<1x4x128xf32>
    %310 = vector.shape_cast %309 : vector<1x4x128xf32> to vector<4x128xf32>
    %cst_132 = arith.constant 0.000000e+00 : f32
    %311 = vector.broadcast %cst_132 : f32 to vector<4x128xf32>
    %312 = arith.subf %311, %310 : vector<4x128xf32>
    %313 = math.exp %312 : vector<4x128xf32>
    %cst_133 = arith.constant 1.000000e+00 : f32
    %314 = vector.broadcast %cst_133 : f32 to vector<4x128xf32>
    %315 = arith.addf %314, %313 : vector<4x128xf32>
    %316 = tpu.reciprocal %315 : vector<4x128xf32> -> vector<4x128xf32>
    %c0_134 = arith.constant 0 : index
    %c20_135 = arith.constant 20 : index
    %c0_136 = arith.constant 0 : index
    %317 = vector.load %arg3[%c0_134, %c20_135, %c0_136] : memref<1x24x128xf32, #tpu.memory_space<vmem>>, vector<1x4x128xf32>
    %318 = vector.shape_cast %317 : vector<1x4x128xf32> to vector<4x128xf32>
    %319 = vector.shape_cast %316 : vector<4x128xf32> to vector<1x4x128xf32>
    tpu.vector_store %arg3[%c0_134, %c20_135, %c0_136], %319 {strides = array<i32>} : memref<1x24x128xf32, #tpu.memory_space<vmem>>, vector<1x4x128xf32>,
    return
  }
  func.func @transform_0(%arg0: i32, %arg1: i32) -> (i32, i32, i32) {
    %c0_i32 = arith.constant 0 : i32
    %c0_i32_0 = arith.constant 0 : i32
    return %arg0, %c0_i32, %arg1 : i32, i32, i32
  }
  func.func @transform_1(%arg0: i32, %arg1: i32) -> (i32, i32, i32) {
    %c0_i32 = arith.constant 0 : i32
    %c0_i32_0 = arith.constant 0 : i32
    return %arg0, %c0_i32, %arg1 : i32, i32, i32
  }
}

</mosaic_0001>

<bundles_post_ra>
// kernel: tpu_custom_call.1
= control target key start
LH: loop header
LB: loop body
LE: loop exit
PB: predicated region body
PF: predicated region fallthrough
CT: control target
= control target key end

     0   :  { %6 = vsyncpa [#allocation3], 0  ;;  %s999_s0 = inlined_call_operand.hbm [shape: f32[2,24,256], index: 0, kind: input, shape index: {}]   ;;  %s1000_s1 = inlined_call_operand.hbm [shape: f32[2,24,256], index: 1, kind: output, shape index: {}]  }
   0x1   :  { %8 = vsyncpa [#allocation3 + $0x1], 0 }
   0x2   :  { %9 = vsyncpa [#allocation4], 0 }
   0x3   :  { %11 = vsyncpa [#allocation4 + $0x1], 0  ;;  %s733_s6 = smov 0   ;;  %s735_s7 = smov 0  }
   0x4   :  { %s737_s8 = smov 0   ;;  %s739_s9 = smov 0  }
   0x5   :  { %s741_s10 = smov 0   ;;  %s743_s11 = smov 0  }
   0x6   :  { %s745_s12 = smov 0   ;;  %s747_s13 = smov 0  }
   0x7 LB: > { %s441_s14 = sadd.s32 4294967295, %s711_s13   ;;  %s442_s15 = sadd.s32 4294967294, %s711_s13   ;;  %s711_s13 = sphi %s747_s13, %s17_s13   ;;  %s707_s12 = sphi %s745_s12, %s1015_s12   ;;  %s703_s11 = sphi %s743_s11, %s1014_s11   ;;  %s699_s10 = sphi %s741_s10, %s1013_s10   ;;  %s695_s9 = sphi %s739_s9, %s1012_s9   ;;  %s691_s8 = sphi %s737_s8, %s1011_s8   ;;  %s687_s7 = sphi %s735_s7, %s1010_s7   ;;  %s683_s6 = sphi %s733_s6, %s1009_s6  }
   0x8   : > { %s26_s16 = sadd.s32 1, %s703_s11  ;;  %s29_s17 = sadd.s32 1, %s707_s12 }
   0x9   : > { %p27_p0 = scmp.ge.s32.totalorder %s26_s16, 2  ;;  %s38_s18 = sadd.s32 1, %s691_s8 }
   0xa   : > { %p45_p1 = scmp.ne.s32.totalorder %s691_s8, %s687_s7  ;;  %p46_p2 = scmp.eq.s32.totalorder %s711_s13, 0 }
   0xb   : > { %s1017_s16 = smov (%p27_p0, %s26_s16), 0  ;;  %s1019_s17 = smov (!%p27_p0, %s29_s17), %s707_s12 }
   0xc   : > { %s34_s19 = ssub.s32 %s703_s11, %s1017_s16  ;;  %p786_p3 = por %p46_p2, %p45_p1 }
   0xd   : > { %p31_p4 = scmp.ge.s32.totalorder %s1019_s17, 2  ;;  %p51_p5 = scmp.ne.s32.totalorder %s687_s7, %s683_s6 }
   0xe   : > { %p52_p6 = scmp.eq.s32.totalorder %s441_s14, 0  ;;  %p77_p7 = scmp.eq.s32.totalorder %s441_s14, 3 }
   0xf   : > { %s1021_s17 = smov (%p31_p4, %s1019_s17), 0  ;;  %p83_p10 = scmp.eq.s32.totalorder %s442_s15, 3 }
  0x10   : > { %p794_p8 = por %p52_p6, %p51_p5  ;;  %p798_p9 = por %p77_p7, %p45_p1 }
  0x11   : > { %s33_s23 = ssub.s32 %s707_s12, %s1021_s17  ;;  %p804_p12 = por %p83_p10, %p51_p5 }
  0x12   : > { %s1004_s22 = scalar_select %p798_p9, 1, 0 }
  0x13   : > { %s35_s24 = sor.u32 %s34_s19, %s33_s23  ;;  %p479_p13 = scmp.lt.s32.totalorder %s711_s13, 4 }
  0x14   : > { %p36_p11 = scmp.eq.s32.totalorder %s35_s24, 0  ;;  %s103_s26 = sand.u32 1, %s691_s8  }
  0x15   : > { %s1005_s25 = scalar_select %p804_p12, 1, 0 }
  0x16   : > { %s811_s27 = scalar_select %p36_p11, %s691_s8, %s38_s18  }
  0x17   : > { %s463_s28 = smul.u32 24, %s103_s26  ;;  %p816_p0 = pnand %p479_p13, %p786_p3 }
  0x18   : > { %s464_s29 = smul.u32 6, %s707_s12  ;;  %s828_s19 = scalar_lea.sflag [#allocation3], %s103_s26 }
  0x19   : > { %s107_s3 = scalar_lea.vmem [#allocation2], %s463_s28  ;;  %p585_p2 = pneg %p816_p0 }
  0x1a   : > { %s112_s2 = sadd.s32 %s703_s11, %s464_s29  ;;  %s115_s4 = sshll.u32 %s107_s3, 4  ;;  %s821_s4 = int_to_ptr.vmem [resolvable:$true] %s115_s4 }
  0x1b   : > { %s445_s5 = sshll.u32 %s112_s2, 7  ;;  %s588_s28 = scalar_lea.hbm %s999_s0, 1536 }
  0x1c   : > { %s826_s18 = scalar_lea.hbm %s999_s0, %s445_s5 }
  0x1d   : > { %s583_s20 = scalar_lea.hbm %s826_s18, 384  ;;  %p589_p5 = scmp.lt.u32.totalorder %s826_s18, %s999_s0 }
  0x1e   : > { %p584_p1 = scmp.ne.s32.totalorder %s826_s18, %s583_s20  ;;  %p590_p6 = scmp.lt.u32.totalorder %s588_s28, %s583_s20 }
  0x1f   : > { %p592_p10 = scmp.lt.u32.totalorder %s583_s20, %s826_s18 }
  0x20   : > { %p586_p3 = pnand %p585_p2, %p584_p1  ;;  %p591_p7 = por %p590_p6, %p589_p5 }
  0x22   : > { %p587_p4 = pneg %p586_p3  ;;  %p593_p11 = por %p592_p10, %p591_p7 }
  0x24   : > { %p594_p13 = pnand %p593_p11, %p587_p4 }
  0x26   : > { %597 = shalt.err (!%p594_p13)
}
  0x27   : > { %s598_s26 = scalar_lea.vmem %s821_s4, 384  ;;  %s713_s3 = smov [#allocation2]  }
  0x28   : > { %p599_p1 = scmp.ne.s32.totalorder %s821_s4, %s598_s26  ;;  %s603_s5 = sshll.u32 %s713_s3, 4  ;;  %s604_s5 = int_to_ptr.vmem [resolvable:$false] %s603_s5 }
  0x29   : > { %s605_s14 = scalar_lea.vmem %s604_s5, 768  ;;  %p606_p9 = scmp.lt.s32.totalorder %s821_s4, %s604_s5 }
  0x2a   : > { %p601_p3 = pnand %p599_p1, %p585_p2  ;;  %p607_p5 = scmp.lt.s32.totalorder %s605_s14, %s598_s26 }
  0x2c   : > { %p602_p12 = pneg %p601_p3  ;;  %p608_p6 = por %p607_p5, %p606_p9 }
  0x2e   : > { %p609_p7 = pnand %p608_p6, %p602_p12 }
  0x30   : > { %612 = shalt.err (!%p609_p7)
}
  0x31   : > { %s714_s15 = smov 256   ;;  %s715_s20 = smov 128  }
  0x32   : > { %s716_s23 = smov 8   ;;  %p446_p2 = scmp.ge.s32.totalorder %s711_s13, 1 }
  0x33   : > { %474 = dma.hbm_to_vmem [thread:$0]  (!%p816_p0), %s826_s18, 384, %s821_s4, %s828_s19, %s714_s15, %s715_s20, %s716_s23  }
  0x34   : > { %p123_p4 = scmp.lt.s32.totalorder %s711_s13, 5 }
  0x36   : > { %p124_p10 = pnand %p446_p2, %p123_p4 }
  0x37   : > { %s859_s24 = sand.u32 (!%p124_p10), 1, %s687_s7  }
  0x38   : > { %127 = sbr.rel (%p124_p10) target bundleno = 146 (0x92), region = 24  ;;  %s130_s29 = scalar_lea.sflag (!%p124_p10), [#allocation3], %s859_s24 }
  0x39   : > { %s465_s28 = smul.u32 (!%p124_p10), 24, %s859_s24 }
  0x3b   : > { %s865_s2 = scalar_lea.vmem (!%p124_p10), [#allocation2], %s465_s28 }
  0x3f   : > { %674 = dma.done.wait (%p794_p8), %s130_s29, 384  }
  0x40   : > { %676 = vsyncadd (%p794_p8), %s130_s29, 4294966912  ;;  %v152_v0 = vlaneseq  ;;  %s447_s30 = sshll.u32 %s695_s9, 7  ;;  %v196_v6 = vld [vmem:[%s865_s2] sm:$0x3]  ;;  %v206_v7 = vld [vmem:[%s865_s2 + $0x2] sm:$0x3] }
  0x41   : > { %v155_v1 = vstv %s447_s30  ;;  %v213_v8 = vld [vmem:[%s865_s2 + $0x4] sm:$0xf]  ;;  %v198_v10 = vsub.f32 0.0, %v196_v6  ;;  %v208_v11 = vmul.f32 1.442695, %v206_v7  ;;  %v717_v63 = vmov 1.25  }
  0x42   : > { %v153_v2 = vand.u32 127, %v152_v0  ;;  %v872_v5 = vshrl.u32 %v152_v0, 7  ;;  %v214_v12 = vsub.f32 0.0, %v213_v8  ;;  %v255_v14 = vld [vmem:[%s865_s2 + $0x8] sm:$0x3]  ;;  %s905_s21 = scalar_lea.vmem [#allocation5], %s465_s28 }
  0x43   : > { %v265_v15 = vld [vmem:[%s865_s2 + $0xa] sm:$0x3]  ;;  %v199_v18 = vmul.f32 1.442695, %v198_v10  ;;  %553 = vpow2.f32 %v208_v11  ;;  %v272_v20 = vld [vmem:[%s865_s2 + $0xc] sm:$0xf] }
  0x44   : > { %v156_v3 = vadd.s32 %v155_v1, %v153_v2  ;;  %v215_v19 = vmul.f32 1.442695, %v214_v12  ;;  %v257_v22 = vsub.f32 0.0, %v255_v14  ;;  %v267_v23 = vmul.f32 1.442695, %v265_v15  ;;  %s466_s4 = smul.u32 6, %s699_s10 }
  0x45   : > { %v273_v24 = vsub.f32 0.0, %v272_v20  ;;  %555 = vpow2.f32 %v199_v18  ;;  %v314_v28 = vld [vmem:[%s865_s2 + $0x10] sm:$0x3]  ;;  %v324_v32 = vld [vmem:[%s865_s2 + $0x12] sm:$0x3]  ;;  %vm160_vm0 = vcmp.eq.s32.totalorder %v872_v5, 0 }
  0x46   : > { %v157_v4 = vcvt.s32.f32 %v156_v3  ;;  %557 = vpow2.f32 %v215_v19  ;;  %v258_v30 = vmul.f32 1.442695, %v257_v22  ;;  %v316_v35 = vsub.f32 0.0, %v314_v28  ;;  %s350_s18 = sadd.s32 %s695_s9, %s466_s4  ;;  %s353_s19 = sshll.u32 %s905_s21, 4  ;;  %s938_s19 = int_to_ptr.vmem [resolvable:$true] %s353_s19 }
  0x47   : > { %v274_v31 = vmul.f32 1.442695, %v273_v24  ;;  %559 = vpow2.f32 %v267_v23  ;;  %v326_v38 = vmul.f32 1.442695, %v324_v32  ;;  %v718_v1 = vmov 1.625   ;;  %s460_s26 = sshll.u32 %s350_s18, 7 }
  0x48   : > { %v162_v9 = vmul.f32 0.33333334, %v157_v4  ;;  %v220_v13 = vadd.f32 256.0, %v157_v4  ;;  %v279_v16 = vadd.f32 512.0, %v157_v4  ;;  %561 = vpow2.f32 %v258_v30  ;;  %s944_s10 = scalar_lea.hbm %s1000_s1, %s460_s26  ;;  %s339_s14 = scalar_lea.sflag [#allocation4], %s859_s24 }
  0x49   : > { %563 = vpow2.f32 %v274_v31  ;;  %v883_v44 = vmul.f32 1.442695, %v316_v35  ;;  %s613_s15 = scalar_lea.vmem %s938_s19, 384  ;;  %p1007_p9 = scmp.ne.s32.totalorder %s1004_s22, 0 }
  0x4a   : > { %v163_v17 = vfloor.f32 %v162_v9  ;;  %v221_v21 = vmul.f32 0.33333334, %v220_v13  ;;  %v280_v27 = vmul.f32 0.33333334, %v279_v16  ;;  %565 = vpow2.f32 %v326_v38  ;;  %p614_p8 = scmp.ne.s32.totalorder %s938_s19, %s613_s15  ;;  %s719_s9 = smov [#allocation5]  }
  0x4b   : > { %s617_s20 = sshll.u32 %s719_s9, 4  ;;  %s618_s20 = int_to_ptr.vmem [resolvable:$false] %s617_s20 }
  0x4c   : > { %v164_v25 = vmul.f32 3.0, %v163_v17  ;;  %v167_v26 = vadd.f32 1.0, %v163_v17  ;;  %v222_v29 = vfloor.f32 %v221_v21  ;;  %v281_v34 = vfloor.f32 %v280_v27  ;;  %p615_p12 = pnand %p614_p8, %p1007_p9  ;;  %s619_s23 = scalar_lea.vmem %s618_s20, 768 }
  0x4d   : > { %v554_v50 = vpop.eup %553  ;;  %p620_p11 = scmp.lt.s32.totalorder %s938_s19, %s618_s20  ;;  %p621_p13 = scmp.lt.s32.totalorder %s619_s23, %s613_s15 }
  0x4e   : > { %v165_v33 = vsub.f32 %v157_v4, %v164_v25  ;;  %v223_v36 = vmul.f32 3.0, %v222_v29  ;;  %v226_v37 = vadd.f32 1.0, %v222_v29  ;;  %v282_v40 = vmul.f32 3.0, %v281_v34  ;;  %p616_p0 = pneg %p615_p12 }
  0x4f   : > { %v285_v43 = vadd.f32 1.0, %v281_v34  ;;  %v556_v58 = vpop.eup %555  ;;  %p622_p1 = por %p621_p13, %p620_p11 }
  0x50   : > { %vm166_vm1 = vcmp.ge.f32.partialorder %v165_v33, 3.0  ;;  %v448_v39 = vadd.f32 -3.0, %v165_v33  ;;  %v224_v42 = vsub.f32 %v220_v13, %v223_v36  ;;  %v885_v47 = vsub.f32 %v279_v16, %v282_v40  ;;  %v558_v60 = vpop.eup %557 }
  0x51   : > { %v168_v41 = vsel %vm166_vm1, %v167_v26, %v163_v17  ;;  %v201_v62 = vadd.f32 1.0, %v556_v58  ;;  %v560_v3 = vpop.eup %559  ;;  %v217_v7 = vadd.f32 1.0, %v558_v60  ;;  %p623_p3 = pnand %p622_p1, %p616_p0 }
  0x52   : > { %v170_v45 = vsel %vm166_vm1, %v448_v39, %v165_v33  ;;  %v449_v46 = vadd.f32 -1.0, %v168_v41  ;;  %vm225_vm3 = vcmp.ge.f32.partialorder %v224_v42, 3.0  ;;  %v452_v49 = vadd.f32 -3.0, %v224_v42  ;;  %v562_v9 = vpop.eup %561 }
  0x53   : > { %vm171_vm2 = vcmp.lt.f32.partialorder %v170_v45, 0.0  ;;  %v174_v48 = vadd.f32 3.0, %v170_v45  ;;  %v227_v52 = vsel %vm225_vm3, %v226_v37, %v222_v29  ;;  %vm284_vm4 = vcmp.ge.f32.partialorder %v885_v47, 3.0  ;;  %v564_v13 = vpop.eup %563 }
  0x54   : > { %v173_v51 = vsel %vm171_vm2, %v449_v46, %v168_v41  ;;  %v889_v53 = vadd.f32 -3.0, %v885_v47  ;;  %v229_v56 = vsel %vm225_vm3, %v452_v49, %v224_v42  ;;  %v453_v57 = vadd.f32 -1.0, %v227_v52  ;;  %v899_v21 = vpop.eup %565  ;;  %v331_v49 = vld [vmem:[%s865_s2 + $0x14] sm:$0xf] }
  0x55   : > { %v176_v54 = vmul.f32 0.0625, %v173_v51  ;;  %v175_v55 = vsel %vm171_vm2, %v174_v48, %v170_v45  ;;  %vm230_vm7 = vcmp.lt.f32.partialorder %v229_v56, 0.0  ;;  %v233_v59 = vadd.f32 3.0, %v229_v56 }
  0x56   : > { %vm190_vm5 = vcmp.eq.f32.partialorder %v175_v55, 1.0  ;;  %vm193_vm6 = vcmp.eq.f32.partialorder %v175_v55, 2.0  ;;  %v232_v8 = vsel %vm230_vm7, %v453_v57, %v227_v52  ;;  %567 = vrcp.f32 %v201_v62 }
  0x57   : > { %v177_v61 = vfloor.f32 %v176_v54  ;;  %v191_v0 = vsel %vm190_vm5, 2.0, %v717_v63  ;;  %v192_v2 = vsel %vm190_vm5, 3.75, %v718_v1  ;;  %569 = vrcp.f32 %v217_v7 }
  0x58   : > { %v194_v4 = vsel %vm193_vm6, 4.125, %v191_v0  ;;  %v195_v6 = vsel %vm193_vm6, 2.875, %v192_v2  ;;  %v235_v15 = vmul.f32 0.0625, %v232_v8  ;;  %v260_v16 = vadd.f32 1.0, %v562_v9 }
  0x59   : > { %v178_v10 = vmul.f32 16.0, %v177_v61  ;;  %v181_v11 = vadd.f32 1.0, %v177_v61  ;;  %v207_v12 = vsel %vm160_vm0, %v194_v4, %v195_v6  ;;  %v234_v18 = vsel %vm230_vm7, %v233_v59, %v229_v56 }
  0x5a   : > { %v210_v14 = vmul.f32 %v554_v50, %v207_v12  ;;  %v276_v19 = vadd.f32 1.0, %v564_v13  ;;  %v286_v20 = vsel %vm284_vm4, %v285_v43, %v281_v34  ;;  %v236_v23 = vfloor.f32 %v235_v15 }
  0x5b   : > { %v179_v17 = vsub.f32 %v173_v51, %v178_v10  ;;  %571 = vrcp.f32 %v260_v16  ;;  %vm249_vm8 = vcmp.eq.f32.partialorder %v234_v18, 1.0  ;;  %vm252_vm10 = vcmp.eq.f32.partialorder %v234_v18, 2.0 }
  0x5c   : > { %v211_v22 = vmul.f32 8.0, %v210_v14  ;;  %v250_v25 = vsel %vm249_vm8, 2.0, %v717_v63  ;;  %v251_v26 = vsel %vm249_vm8, 3.75, %v718_v1  ;;  %v237_v28 = vmul.f32 16.0, %v236_v23 }
  0x5d   : > { %vm180_vm9 = vcmp.ge.f32.partialorder %v179_v17, 16.0  ;;  %v450_v24 = vadd.f32 -16.0, %v179_v17  ;;  %v240_v29 = vadd.f32 1.0, %v236_v23  ;;  %v253_v32 = vsel %vm252_vm10, 4.125, %v250_v25 }
  0x5e   : > { %v182_v27 = vsel %vm180_vm9, %v181_v11, %v177_v61  ;;  %212 = vst [vmem:[%s905_s21 + $0x2] sm:$0x3] %v211_v22  ;;  %v254_v33 = vsel %vm252_vm10, 2.875, %v251_v26  ;;  %v238_v35 = vsub.f32 %v232_v8, %v237_v28  ;;  %573 = vrcp.f32 %v276_v19 }
  0x5f   : > { %v184_v30 = vsel %vm180_vm9, %v450_v24, %v179_v17  ;;  %v451_v31 = vadd.f32 -1.0, %v182_v27  ;;  %v266_v36 = vsel %vm160_vm0, %v253_v32, %v254_v33  ;;  %v288_v39 = vsel %vm284_vm4, %v889_v53, %v885_v47 }
  0x60   : > { %vm185_vm11 = vcmp.lt.f32.partialorder %v184_v30, 0.0  ;;  %v188_v34 = vadd.f32 16.0, %v184_v30  ;;  %v269_v38 = vmul.f32 %v560_v3, %v266_v36  ;;  %vm239_vm12 = vcmp.ge.f32.partialorder %v238_v35, 16.0  ;;  %v568_v42 = vpop.eup %567 }
  0x61   : > { %v187_v37 = vsel %vm185_vm11, %v451_v31, %v182_v27  ;;  %v454_v41 = vadd.f32 -16.0, %v238_v35  ;;  %vm289_vm13 = vcmp.lt.f32.partialorder %v288_v39, 0.0  ;;  %v241_v45 = vsel %vm239_vm12, %v240_v29, %v236_v23  ;;  %v570_v50 = vpop.eup %569 }
  0x62   : > { %v189_v40 = vsel %vm185_vm11, %v188_v34, %v184_v30  ;;  %v270_v46 = vmul.f32 8.0, %v269_v38  ;;  %v457_v48 = vadd.f32 -1.0, %v286_v20  ;;  %v455_v54 = vadd.f32 -1.0, %v241_v45  ;;  %219 = vst [vmem:[%s905_s21 + $0x4] sm:$0xf] %v570_v50 }
  0x63   : > { %v197_v43 = vsel %vm160_vm0, %v187_v37, %v189_v40  ;;  %v243_v52 = vsel %vm239_vm12, %v454_v41, %v238_v35  ;;  %575 = vpow2.f32 %v883_v44  ;;  %v292_v55 = vadd.f32 3.0, %v288_v39 }
  0x64   : > { %v203_v51 = vadd.f32 %v568_v42, %v197_v43  ;;  %vm244_vm14 = vcmp.lt.f32.partialorder %v243_v52, 0.0  ;;  %v247_v47 = vadd.f32 16.0, %v243_v52  ;;  %271 = vst [vmem:[%s905_s21 + $0xa] sm:$0x3] %v270_v46  ;;  %v291_v53 = vsel %vm289_vm13, %v457_v48, %v286_v20 }
  0x65   : > { %v572_v56 = vpop.eup %571  ;;  %v246_v58 = vsel %vm244_vm14, %v455_v54, %v241_v45  ;;  %v294_v59 = vmul.f32 0.0625, %v291_v53  ;;  %v332_v60 = vsub.f32 0.0, %v331_v49  ;;  %v293_v62 = vsel %vm289_vm13, %v292_v55, %v288_v39 }
  0x66   : > { %v204_v57 = vmul.f32 8.0, %v203_v51  ;;  %v248_v61 = vsel %vm244_vm14, %v247_v47, %v243_v52  ;;  %vm308_vm15 = vcmp.eq.f32.partialorder %v293_v62, 1.0  ;;  %vm311_vm1 = vcmp.eq.f32.partialorder %v293_v62, 2.0 }
  0x67   : > { %v256_v0 = vsel %vm160_vm0, %v246_v58, %v248_v61  ;;  %v295_v44 = vfloor.f32 %v294_v59  ;;  %v309_v3 = vsel %vm308_vm15, 2.0, %v717_v63  ;;  %v310_v4 = vsel %vm308_vm15, 3.75, %v718_v1 }
  0x68   : > { %205 = vst [vmem:[%s905_s21] sm:$0x3] %v204_v57  ;;  %v262_v2 = vadd.f32 %v572_v56, %v256_v0  ;;  %v333_v6 = vmul.f32 1.442695, %v332_v60  ;;  %v312_v8 = vsel %vm311_vm1, 4.125, %v309_v3  ;;  %v313_v9 = vsel %vm311_vm1, 2.875, %v310_v4  ;;  %v574_v10 = vpop.eup %573 }
  0x69   : > { %v296_v7 = vmul.f32 16.0, %v295_v44  ;;  %v299_v12 = vadd.f32 1.0, %v295_v44  ;;  %v325_v13 = vsel %vm160_vm0, %v312_v8, %v313_v9  ;;  %278 = vst [vmem:[%s905_s21 + $0xc] sm:$0xf] %v574_v10 }
  0x6a   : > { %v263_v11 = vmul.f32 8.0, %v262_v2  ;;  %577 = vpow2.f32 %v333_v6  ;;  %v328_v15 = vmul.f32 %v899_v21, %v325_v13 }
  0x6b   : > { %v297_v14 = vsub.f32 %v291_v53, %v296_v7 }
  0x6c   : > { %264 = vst [vmem:[%s905_s21 + $0x8] sm:$0x3] %v263_v11  ;;  %v329_v16 = vmul.f32 8.0, %v328_v15 }
  0x6d   : > { %v576_v63 = vpop.eup %575  ;;  %vm298_vm2 = vcmp.ge.f32.partialorder %v297_v14, 16.0  ;;  %v458_v1 = vadd.f32 -16.0, %v297_v14 }
  0x6e   : > { %v300_v17 = vsel %vm298_vm2, %v299_v12, %v295_v44  ;;  %v319_v18 = vadd.f32 1.0, %v576_v63  ;;  %330 = vst [vmem:[%s905_s21 + $0x12] sm:$0x3] %v329_v16 }
  0x6f   : > { %v302_v19 = vsel %vm298_vm2, %v458_v1, %v297_v14  ;;  %v459_v20 = vadd.f32 -1.0, %v300_v17 }
  0x70   : > { %579 = vrcp.f32 %v319_v18  ;;  %v306_v22 = vadd.f32 16.0, %v302_v19  ;;  %vm303_vm3 = vcmp.lt.f32.partialorder %v302_v19, 0.0 }
  0x71   : > { %v305_v24 = vsel %vm303_vm3, %v459_v20, %v300_v17 }
  0x72   : > { %v307_v21 = vsel %vm303_vm3, %v306_v22, %v302_v19 }
  0x73   : > { %v315_v26 = vsel %vm160_vm0, %v305_v24, %v307_v21 }
  0x74   : > { %v578_v23 = vpop.eup %577 }
  0x75   : > { %v335_v25 = vadd.f32 1.0, %v578_v23 }
  0x77   : > { %581 = vrcp.f32 %v335_v25 }
  0x7a   : > { %v580_v27 = vpop.eup %579 }
  0x7b   : > { %v321_v28 = vadd.f32 %v580_v27, %v315_v26 }
  0x7d   : > { %v322_v29 = vmul.f32 8.0, %v321_v28 }
  0x7f   : > { %323 = vst [vmem:[%s905_s21 + $0x10] sm:$0x3] %v322_v29 }
  0x81   : > { %v582_v5 = vpop.eup %581 }
  0x82   : > { %337 = vst [vmem:[%s905_s21 + $0x14] sm:$0xf] %v582_v5 }
  0x83   : > { %626 = shalt.err (!%p623_p3)
}
  0x84   : > { %s627_s28 = scalar_lea.hbm %s944_s10, 384  ;;  %s631_s30 = scalar_lea.hbm %s1000_s1, 1536 }
  0x85   : > { %p628_p5 = scmp.ne.s32.totalorder %s944_s10, %s627_s28  ;;  %p632_p2 = scmp.lt.u32.totalorder %s944_s10, %s1000_s1 }
  0x86   : > { %p633_p4 = scmp.lt.u32.totalorder %s631_s30, %s627_s28  ;;  %p635_p8 = scmp.lt.u32.totalorder %s627_s28, %s944_s10 }
  0x87   : > { %p629_p6 = pnand %p628_p5, %p1007_p9 }
  0x88   : > { %p634_p10 = por %p633_p4, %p632_p2 }
  0x89   : > { %p630_p7 = pneg %p629_p6 }
  0x8a   : > { %p636_p12 = por %p635_p8, %p634_p10 }
  0x8c   : > { %p637_p0 = pnand %p636_p12, %p630_p7 }
  0x8e   : > { %640 = shalt.err (!%p637_p0)
}
  0x8f   : > { %s720_s18 = smov 128   ;;  %s721_s26 = smov 256  }
  0x90   : > { %s722_s3 = smov 8  }
  0x91   : > { %469 = dma.vmem_to_hbm [thread:$0]  (%p1007_p9), %s938_s19, 384, %s944_s10, %s339_s14, %s720_s18, %s721_s26, %s722_s3  }
  0x92 PF: > { %p480_p11 = scmp.ge.s32.totalorder %s711_s13, 2  ;;  %s368_s5 = sand.u32 1, %s683_s6  }
  0x93   : > { %p1008_p13 = scmp.ne.s32.totalorder %s1005_s25, 0  ;;  %s369_s15 = scalar_lea.sflag [#allocation4], %s368_s5 }
  0x95   : > { %p476_p1 = pnand %p480_p11, %p1008_p13 }
  0x97   : > { %678 = dma.done.wait (!%p476_p1), %s369_s15, 384  }
  0x98   : > { %680 = vsyncadd (!%p476_p1), %s369_s15, 4294966912  ;;  %s17_s13 = sadd.s32 1, %s711_s13   ;;  %s1009_s6 = smov %s687_s7 }
  0x99   : > { %p14_p3 = scmp.ge.s32.totalorder %s17_s13, 6   ;;  %s1010_s7 = smov %s691_s8 }
  0x9a   : > { %s1011_s8 = smov %s811_s27  ;;  %s1012_s9 = smov %s703_s11 }
  0x9b   : > { %s1013_s10 = smov %s707_s12  ;;  %s1014_s11 = smov %s1017_s16 }
  0x9c   : > { %s1015_s12 = smov %s1021_s17  ;;  %16 = sbr.rel (!%p14_p3) target bundleno = 7 (0x7), region = 69 }
  0xa3   :  { %374 = vsyncpa [#allocation3], 1 }
  0xa4   :  { %376 = vsyncpa [#allocation3 + $0x1], 1 }
  0xa5   :  { %377 = vsyncpa [#allocation4], 1 }
  0xa6   :  { %379 = vsyncpa [#allocation4 + $0x1], 1 }

</bundles_post_ra>
